<compile_context>
chip_gen: v7x
topology: tpu7x:2x2x1
jax: 0.10.0
libtpu: 0.0.40
codegen_flags: <defaults>
</compile_context>

<pallas_src>
import functools

import jax
import jax.numpy as jnp
from jax.experimental import pallas as pl
from jax.experimental.pallas import tpu as pltpu


def _round_up(x, m):
    return ((x + m - 1) // m) * m


def qnet_kernel(x_ref, w1_ref, b1_ref, wh_ref, bh_ref, wo_ref, bo_ref, out_ref):
    # feature: Linear + ReLU                          (TB, S) @ (S, 64) -> (TB, 64)
    h = jnp.dot(x_ref[...], w1_ref[...], preferred_element_type=jnp.float32)
    h = jnp.maximum(h + b1_ref[...], 0.0)

    # fused advantage|value hidden layer: Linear+ReLU (TB, 64) @ (64, 128) -> (TB, 128)
    z = jnp.dot(h, wh_ref[...], preferred_element_type=jnp.float32)
    z = jnp.maximum(z + bh_ref[...], 0.0)

    # fused output: centered-advantage + value already folded into wo/bo
    #                                                 (TB, 128) @ (128, A) -> (TB, A)
    out_ref[...] = jnp.dot(z, wo_ref[...], preferred_element_type=jnp.float32) + bo_ref[...]


def pack_params(p):
    """One-time host-side fusion of the torch-layout params into 3 weights + 3 biases."""
    A = p["wa2"].shape[1]
    # hidden layer of both heads fused -> lane-dense (64, 128)
    wh = jnp.concatenate([p["wa1"], p["wv1"]], axis=1)            # (64, 128)
    bh = jnp.concatenate([p["ba1"], p["bv1"]], axis=1)            # (1, 128)
    # dueling mean folded into the advantage output weights:
    #   adv - mean(adv, 1) == a_h @ (wa2 - colmean(wa2)) + (ba2 - mean(ba2))
    wa2_c = p["wa2"] - jnp.mean(p["wa2"], axis=1, keepdims=True)  # (64, A)
    ba2_c = p["ba2"] - jnp.mean(p["ba2"])                         # (1, A)
    # value broadcast folded in: bottom 64 rows replicate wv2 across all A columns
    wo = jnp.concatenate([wa2_c, jnp.tile(p["wv2"], (1, A))], axis=0)  # (128, A)
    bo = ba2_c + p["bv2"]                                              # (1, A)
    return dict(w1=p["w1"], b1=p["b1"], wh=wh, bh=bh, wo=wo, bo=bo)


@functools.partial(jax.jit, static_argnames=("tb",))
def qnetwork_forward(state, packed, *, tb=512):
    """state: (B, state_size) f32.  packed: output of pack_params()."""
    B, S = state.shape
    fc1 = packed["w1"].shape[1]
    fch = packed["wh"].shape[1]
    A = packed["wo"].shape[1]

    # Batch tile: multiple of 8, capped so tiny batches don't over-pad.
    TB = min(_round_up(tb, 8), _round_up(B, 8))
    Bp = _round_up(B, TB)
    x = state if Bp == B else jnp.pad(state, ((0, Bp - B), (0, 0)))

    itemsize = 4  # f32
    weight_bytes = (S * fc1 + fc1 + fc1 * fch + fch + fch * A + A) * itemsize
    cost = pl.CostEstimate(
        flops=2 * Bp * (S * fc1 + fc1 * fch + fch * A),
        transcendentals=0,
        bytes_accessed=Bp * S * itemsize + weight_bytes + Bp * A * itemsize,
    )

    const = lambda i: (0, 0)  # weights stay resident across all batch blocks
    out = pl.pallas_call(
        qnet_kernel,
        out_shape=jax.ShapeDtypeStruct((Bp, A), jnp.float32),
        grid=(Bp // TB,),
        in_specs=[
            pl.BlockSpec((TB, S), lambda i: (i, 0)),   # state tile (pipelined)
            pl.BlockSpec((S, fc1), const),             # w1
            pl.BlockSpec((1, fc1), const),             # b1
            pl.BlockSpec((fc1, fch), const),           # wh  (fused wa1|wv1)
            pl.BlockSpec((1, fch), const),             # bh
            pl.BlockSpec((fch, A), const),             # wo  (centered wa2 / tiled wv2)
            pl.BlockSpec((1, A), const),               # bo
        ],
        # out last dim A < 128 -> masked vreg stores, but the (TB, A) block spans
        # all columns so the HBM writeback stays a single contiguous DMA.
        out_specs=pl.BlockSpec((TB, A), lambda i: (i, 0)),
        compiler_params=pltpu.CompilerParams(
            dimension_semantics=("parallel",),         # lets v7x shard batch over 2 TCs
        ),
        cost_estimate=cost,
    )(x, packed["w1"], packed["b1"], packed["wh"], packed["bh"],
      packed["wo"], packed["bo"])
    return out[:B] if Bp != B else out


def init_params(key, state_size, action_size, fc1_units=64, fc2_units=64):
    """Deterministic PyTorch-style init: U(-1/sqrt(fan_in), 1/sqrt(fan_in))."""
    def linear(k, fan_in, fan_out):
        kw, kb = jax.random.split(k)
        bound = 1.0 / jnp.sqrt(float(fan_in))
        w = jax.random.uniform(kw, (fan_in, fan_out), jnp.float32, -bound, bound)
        b = jax.random.uniform(kb, (1, fan_out), jnp.float32, -bound, bound)
        return w, b

    keys = jax.random.split(key, 5)
    w1, b1 = linear(keys[0], state_size, fc1_units)
    wa1, ba1 = linear(keys[1], fc1_units, fc2_units)
    wa2, ba2 = linear(keys[2], fc2_units, action_size)
    wv1, bv1 = linear(keys[3], fc1_units, fc2_units)
    wv2, bv2 = linear(keys[4], fc2_units, 1)
    return dict(w1=w1, b1=b1, wa1=wa1, ba1=ba1, wa2=wa2, ba2=ba2,
                wv1=wv1, bv1=bv1, wv2=wv2, bv2=bv2)


def qnetwork_ref(state, p):
    """Pure-JAX reference on the ORIGINAL (unfused) params."""
    h = jnp.maximum(state @ p["w1"] + p["b1"], 0.0)
    adv = jnp.maximum(h @ p["wa1"] + p["ba1"], 0.0) @ p["wa2"] + p["ba2"]
    val = jnp.maximum(h @ p["wv1"] + p["bv1"], 0.0) @ p["wv2"] + p["bv2"]
    return val + (adv - adv.mean(axis=1, keepdims=True))


if __name__ == "__main__":
    key = jax.random.PRNGKey(0)
    k_params, k_state, k_state2 = jax.random.split(key, 3)

    state_size = 8
    action_size = 4

    params = init_params(k_params, state_size, action_size, fc1_units=64, fc2_units=64)
    packed = pack_params(params)

    # Small batch (single block).
    state = jax.random.normal(k_state, (8, state_size), dtype=jnp.float32)
    out = jax.block_until_ready(qnetwork_forward(state, packed))
    ref = qnetwork_ref(state, params)
    assert out.shape == (8, action_size)
    assert jnp.allclose(out, ref, atol=1e-4, rtol=1e-4), "mismatch vs reference (B=8)"

    # Ragged batch + multi-block grid (exercises padding and resident weights).
    state2 = jax.random.normal(k_state2, (20, state_size), dtype=jnp.float32)
    out2 = jax.block_until_ready(qnetwork_forward(state2, packed, tb=8))
    ref2 = qnetwork_ref(state2, params)
    assert out2.shape == (20, action_size)
    assert jnp.allclose(out2, ref2, atol=1e-4, rtol=1e-4), "mismatch vs reference (B=20)"

    print("KERNEL_OK")
</pallas_src>

<mosaic_0001>
module attributes {stable_mosaic.version = 11 : i64} {
  func.func @qnet_kernel(%arg0: i32, %arg1: memref<8x8xf32, #tpu.memory_space<vmem>>, %arg2: memref<8x64xf32, #tpu.memory_space<vmem>>, %arg3: memref<1x64xf32, #tpu.memory_space<vmem>>, %arg4: memref<64x128xf32, #tpu.memory_space<vmem>>, %arg5: memref<1x128xf32, #tpu.memory_space<vmem>>, %arg6: memref<128x4xf32, #tpu.memory_space<vmem>>, %arg7: memref<1x4xf32, #tpu.memory_space<vmem>>, %arg8: memref<8x4xf32, #tpu.memory_space<vmem>>) attributes {dimension_semantics = [#tpu.dimension_semantics<parallel>], iteration_bounds = array<i64: 1>, scalar_prefetch = 0 : i64, scratch_operands = 0 : i64, tpu.core_type = #tpu.core_type<tc>, window_params = [{transform_indices = @transform_0, window_bounds = array<i64: 8, 8>}, {pipeline_mode = #tpu.pipeline_mode<synchronous>, transform_indices = @transform_1, window_bounds = array<i64: 8, 64>}, {pipeline_mode = #tpu.pipeline_mode<synchronous>, transform_indices = @transform_2, window_bounds = array<i64: 1, 64>}, {pipeline_mode = #tpu.pipeline_mode<synchronous>, transform_indices = @transform_3, window_bounds = array<i64: 64, 128>}, {pipeline_mode = #tpu.pipeline_mode<synchronous>, transform_indices = @transform_4, window_bounds = array<i64: 1, 128>}, {pipeline_mode = #tpu.pipeline_mode<synchronous>, transform_indices = @transform_5, window_bounds = array<i64: 128, 4>}, {pipeline_mode = #tpu.pipeline_mode<synchronous>, transform_indices = @transform_6, window_bounds = array<i64: 1, 4>}, {transform_indices = @transform_7, window_bounds = array<i64: 8, 4>}]} {
    %c0 = arith.constant 0 : index
    %c0_0 = arith.constant 0 : index
    %0 = vector.load %arg1[%c0, %c0_0] : memref<8x8xf32, #tpu.memory_space<vmem>>, vector<8x8xf32>
    %c0_1 = arith.constant 0 : index
    %c0_2 = arith.constant 0 : index
    %1 = vector.load %arg2[%c0_1, %c0_2] : memref<8x64xf32, #tpu.memory_space<vmem>>, vector<8x64xf32>
    %cst = arith.constant dense<0.000000e+00> : vector<8x64xf32>
    %2 = tpu.matmul %0, %1, %cst {dimension_numbers = #tpu.dot_dimension_numbers<[1], [0], [0], [1], [0, 0, 1, 1], [], []>} : vector<8x8xf32>, vector<8x64xf32>, vector<8x64xf32> -> vector<8x64xf32>
    %c0_3 = arith.constant 0 : index
    %c0_4 = arith.constant 0 : index
    %3 = vector.load %arg3[%c0_3, %c0_4] : memref<1x64xf32, #tpu.memory_space<vmem>>, vector<1x64xf32>
    %4 = vector.broadcast %3 : vector<1x64xf32> to vector<8x64xf32>
    %5 = arith.addf %2, %4 : vector<8x64xf32>
    %cst_5 = arith.constant 0.000000e+00 : f32
    %6 = vector.broadcast %cst_5 : f32 to vector<8x64xf32>
    %7 = arith.maximumf %5, %6 : vector<8x64xf32>
    %c0_6 = arith.constant 0 : index
    %c0_7 = arith.constant 0 : index
    %8 = vector.load %arg4[%c0_6, %c0_7] : memref<64x128xf32, #tpu.memory_space<vmem>>, vector<64x128xf32>
    %cst_8 = arith.constant dense<0.000000e+00> : vector<8x128xf32>
    %9 = tpu.matmul %7, %8, %cst_8 {dimension_numbers = #tpu.dot_dimension_numbers<[1], [0], [0], [1], [0, 0, 1, 1], [], []>} : vector<8x64xf32>, vector<64x128xf32>, vector<8x128xf32> -> vector<8x128xf32>
    %c0_9 = arith.constant 0 : index
    %c0_10 = arith.constant 0 : index
    %10 = vector.load %arg5[%c0_9, %c0_10] : memref<1x128xf32, #tpu.memory_space<vmem>>, vector<1x128xf32>
    %11 = vector.broadcast %10 : vector<1x128xf32> to vector<8x128xf32>
    %12 = arith.addf %9, %11 : vector<8x128xf32>
    %cst_11 = arith.constant 0.000000e+00 : f32
    %13 = vector.broadcast %cst_11 : f32 to vector<8x128xf32>
    %14 = arith.maximumf %12, %13 : vector<8x128xf32>
    %c0_12 = arith.constant 0 : index
    %c0_13 = arith.constant 0 : index
    %15 = vector.load %arg6[%c0_12, %c0_13] : memref<128x4xf32, #tpu.memory_space<vmem>>, vector<128x4xf32>
    %cst_14 = arith.constant dense<0.000000e+00> : vector<8x4xf32>
    %16 = tpu.matmul %14, %15, %cst_14 {dimension_numbers = #tpu.dot_dimension_numbers<[1], [0], [0], [1], [0, 0, 1, 1], [], []>} : vector<8x128xf32>, vector<128x4xf32>, vector<8x4xf32> -> vector<8x4xf32>
    %c0_15 = arith.constant 0 : index
    %c0_16 = arith.constant 0 : index
    %17 = vector.load %arg7[%c0_15, %c0_16] : memref<1x4xf32, #tpu.memory_space<vmem>>, vector<1x4xf32>
    %18 = vector.broadcast %17 : vector<1x4xf32> to vector<8x4xf32>
    %19 = arith.addf %16, %18 : vector<8x4xf32>
    %c0_17 = arith.constant 0 : index
    %c0_18 = arith.constant 0 : index
    %20 = vector.load %arg8[%c0_17, %c0_18] : memref<8x4xf32, #tpu.memory_space<vmem>>, vector<8x4xf32>
    tpu.vector_store %arg8[%c0_17, %c0_18], %19 {strides = array<i32>} : memref<8x4xf32, #tpu.memory_space<vmem>>, vector<8x4xf32>,
    return
  }
  func.func @transform_0(%arg0: i32) -> (i32, i32) {
    %c0_i32 = arith.constant 0 : i32
    %c0_i32_0 = arith.constant 0 : i32
    return %arg0, %c0_i32 : i32, i32
  }
  func.func @transform_1(%arg0: i32) -> (i32, i32) {
    %c0_i32 = arith.constant 0 : i32
    %c0_i32_0 = arith.constant 0 : i32
    %c0_i32_1 = arith.constant 0 : i32
    return %c0_i32, %c0_i32_0 : i32, i32
  }
  func.func @transform_2(%arg0: i32) -> (i32, i32) {
    %c0_i32 = arith.constant 0 : i32
    %c0_i32_0 = arith.constant 0 : i32
    %c0_i32_1 = arith.constant 0 : i32
    return %c0_i32, %c0_i32_0 : i32, i32
  }
  func.func @transform_3(%arg0: i32) -> (i32, i32) {
    %c0_i32 = arith.constant 0 : i32
    %c0_i32_0 = arith.constant 0 : i32
    %c0_i32_1 = arith.constant 0 : i32
    return %c0_i32, %c0_i32_0 : i32, i32
  }
  func.func @transform_4(%arg0: i32) -> (i32, i32) {
    %c0_i32 = arith.constant 0 : i32
    %c0_i32_0 = arith.constant 0 : i32
    %c0_i32_1 = arith.constant 0 : i32
    return %c0_i32, %c0_i32_0 : i32, i32
  }
  func.func @transform_5(%arg0: i32) -> (i32, i32) {
    %c0_i32 = arith.constant 0 : i32
    %c0_i32_0 = arith.constant 0 : i32
    %c0_i32_1 = arith.constant 0 : i32
    return %c0_i32, %c0_i32_0 : i32, i32
  }
  func.func @transform_6(%arg0: i32) -> (i32, i32) {
    %c0_i32 = arith.constant 0 : i32
    %c0_i32_0 = arith.constant 0 : i32
    %c0_i32_1 = arith.constant 0 : i32
    return %c0_i32, %c0_i32_0 : i32, i32
  }
  func.func @transform_7(%arg0: i32) -> (i32, i32) {
    %c0_i32 = arith.constant 0 : i32
    %c0_i32_0 = arith.constant 0 : i32
    return %arg0, %c0_i32 : i32, i32
  }
}

</mosaic_0001>

<bundles_post_ra>
// kernel: qnetwork_forward.1
= control target key start
LH: loop header
LB: loop body
LE: loop exit
PB: predicated region body
PF: predicated region fallthrough
CT: control target
= control target key end

     0   :  { %vm35_vm0 = vcmask 64512   ;;  %v430_v0 = vmov 0.0   ;;  %vm431_vm1 = vmmov 0   ;;  %v432_v7 = vmov 0.0|0.0   ;;  %s563_s1 = inlined_call_operand.vmem [shape: f32[8,64], index: 1, kind: input, shape index: {}]   ;;  %s564_s0 = inlined_call_operand.vmem [shape: f32[8,8], index: 0, kind: input, shape index: {}]   ;;  %s565_s3 = inlined_call_operand.vmem [shape: f32[64,128], index: 3, kind: input, shape index: {}]   ;;  %s566_s5 = inlined_call_operand.vmem [shape: f32[128,4], index: 5, kind: input, shape index: {}]   ;;  %s567_s2 = inlined_call_operand.vmem [shape: f32[1,64], index: 2, kind: input, shape index: {}]   ;;  %s568_s4 = inlined_call_operand.vmem [shape: f32[1,128], index: 4, kind: input, shape index: {}]   ;;  %s569_s6 = inlined_call_operand.vmem [shape: f32[1,4], index: 6, kind: input, shape index: {}]   ;;  %s570_s7 = inlined_call_operand.vmem [shape: f32[8,4], index: 7, kind: output, shape index: {}]  }
   0x1   :  { %332 = vmatprep.subr.mxu1 %v430_v0  ;;  %v27_v1 = vld [vmem:[%s563_s1] sm:$0xff]  ;;  %334 = vmatprep.mubr.msk.f32.mxu1 %vm431_vm1, %v430_v0  ;;  %v111_v4 = vld [vmem:[%s565_s3 + $0x8] sm:$0xff]  ;;  %v112_v5 = vld [vmem:[%s565_s3 + $0x10] sm:$0xff]  ;;  %vm125_vm2 = vcmask 523264   ;;  %vm293_vm3 = vcmask 31744  }
   0x2   :  { %v26_v2 = vld [vmem:[%s564_s0] sm:$0xff]  ;;  %333 = vmatpush3.msra.mxu1 %v27_v1  ;;  %v113_v6 = vld [vmem:[%s565_s3 + $0x18] sm:$0xff]  ;;  %403 = vmatprep.subr.bf16.mxu0 %v432_v7  ;;  %v115_v11 = vld [vmem:[%s565_s3 + $0x28] sm:$0xff] }
   0x3   :  { %v110_v3 = vld [vmem:[%s565_s3] sm:$0xff]  ;;  %335 = vmatmul.mubr.msk.f32.vlgmr.msra.gmra.mrb[0].mxu1 %vm35_vm0, %v26_v2  ;;  %391 = vmatprep.subr.bf16.mxu1 %v432_v7  ;;  %v395_v9 = vpack.c.bf16 %v113_v6, %v112_v5  ;;  %v116_v13 = vld [vmem:[%s565_s3 + $0x30] sm:$0xff]  ;;  %v117_v14 = vld [vmem:[%s565_s3 + $0x38] sm:$0xff] }
   0x4   :  { %v392_v8 = vpack.c.bf16 %v111_v4, %v110_v3  ;;  %353 = vmatprep.mubr.msk.f32.mxu1 %vm431_vm1, %v430_v0  ;;  %388 = vmatprep.mubr.msk.f32.mxu0 %vm431_vm1, %v430_v0  ;;  %v114_v10 = vld [vmem:[%s565_s3 + $0x20] sm:$0xff]  ;;  %v401_v15 = vpack.c.bf16 %v117_v14, %v116_v13  ;;  %v201_v17 = vld [vmem:[%s566_s5 + $0x8] sm:$0xff]  ;;  %v202_v18 = vld [vmem:[%s566_s5 + $0x10] sm:$0xff] }
   0x5   :  { %v398_v12 = vpack.c.bf16 %v115_v11, %v114_v10  ;;  %v200_v16 = vld [vmem:[%s566_s5] sm:$0xff]  ;;  %v203_v20 = vld [vmem:[%s566_s5 + $0x18] sm:$0xff]  ;;  %v205_v23 = vld [vmem:[%s566_s5 + $0x28] sm:$0xff] }
   0x6   :  { %393 = vmatpush3.bf16.msra.mxu1 %v392_v8  ;;  %v404_v19 = vpack.c.bf16 %v201_v17, %v200_v16  ;;  %v407_v21 = vpack.c.bf16 %v203_v20, %v202_v18  ;;  %v204_v22 = vld [vmem:[%s566_s5 + $0x20] sm:$0xff]  ;;  %v206_v25 = vld [vmem:[%s566_s5 + $0x30] sm:$0xff]  ;;  %v207_v26 = vld [vmem:[%s566_s5 + $0x38] sm:$0xff] }
   0x7   :  { %394 = vmatprep.subr.bf16.mxu1 %v432_v7  ;;  %v410_v24 = vpack.c.bf16 %v205_v23, %v204_v22  ;;  %v413_v27 = vpack.c.bf16 %v207_v26, %v206_v25  ;;  %v208_v28 = vld [vmem:[%s566_s5 + $0x40] sm:$0xff]  ;;  %v209_v29 = vld [vmem:[%s566_s5 + $0x48] sm:$0xff]  ;;  %v210_v31 = vld [vmem:[%s566_s5 + $0x50] sm:$0xff] }
   0x8   :  { %405 = vmatpush3.bf16.msra.mxu0 %v404_v19  ;;  %v416_v30 = vpack.c.bf16 %v209_v29, %v208_v28  ;;  %v211_v32 = vld [vmem:[%s566_s5 + $0x58] sm:$0xff]  ;;  %v212_v34 = vld [vmem:[%s566_s5 + $0x60] sm:$0xff]  ;;  %v213_v35 = vld [vmem:[%s566_s5 + $0x68] sm:$0xff] }
   0x9   :  { %406 = vmatprep.subr.bf16.mxu0 %v432_v7  ;;  %v419_v33 = vpack.c.bf16 %v211_v32, %v210_v31  ;;  %v422_v36 = vpack.c.bf16 %v213_v35, %v212_v34  ;;  %v299_v37 = vld [vmem:[%s567_s2] ss:$0 sm:$0xff]  ;;  %v214_v42 = vld [vmem:[%s566_s5 + $0x70] sm:$0xff]  ;;  %v215_v43 = vld [vmem:[%s566_s5 + $0x78] sm:$0xff] }
   0xa   :  { %396 = vmatpush3.bf16.msra.mxu1 %v395_v9  ;;  %v425_v44 = vpack.c.bf16 %v215_v43, %v214_v42  ;;  %v301_v45 = vld [vmem:[%s568_s4] ss:$0 sm:$0xff] }
   0xb   :  { %397 = vmatprep.subr.bf16.mxu1 %v432_v7  ;;  %v303_v50 = vld [vmem:[%s569_s6] ss:$0 sm:$0xff] }
   0xc   :  { %408 = vmatpush3.bf16.msra.mxu0 %v407_v21 }
   0xd   :  { %409 = vmatprep.subr.bf16.mxu0 %v432_v7 }
   0xe   :  { %399 = vmatpush3.bf16.msra.mxu1 %v398_v12 }
   0xf   :  { %400 = vmatprep.subr.bf16.mxu1 %v432_v7 }
  0x10   :  { %411 = vmatpush3.bf16.msra.mxu0 %v410_v24 }
  0x11   :  { %412 = vmatprep.subr.bf16.mxu0 %v432_v7 }
  0x12   :  { %402 = vmatpush3.bf16.msra.mxu1 %v401_v15 }
  0x14   :  { %414 = vmatpush3.bf16.msra.mxu0 %v413_v27 }
  0x15   :  { %415 = vmatprep.subr.bf16.mxu0 %v432_v7 }
  0x18   :  { %417 = vmatpush3.bf16.msra.mxu0 %v416_v30 }
  0x19   :  { %418 = vmatprep.subr.bf16.mxu0 %v432_v7 }
  0x1c   :  { %420 = vmatpush3.bf16.msra.mxu0 %v419_v33 }
  0x1d   :  { %421 = vmatprep.subr.bf16.mxu0 %v432_v7 }
  0x20   :  { %423 = vmatpush3.bf16.msra.mxu0 %v422_v36 }
  0x21   :  { %424 = vmatprep.subr.bf16.mxu0 %v432_v7 }
  0x24   :  { %426 = vmatpush3.bf16.msra.mxu0 %v425_v44 }
  0xd6   :  { %v105_v38 = vpop.f32.mrb[0].mxu1 }
  0xd7   :  { %v106_v39 = vadd.f32 %v299_v37, %v105_v38  ;;  %v336_v40 = vpop.f32.mrb[1].mxu1 }
  0xd9   :  { %v109_v41 = vmax.f32 %v106_v39, 0.0 }
  0xdb   :  { %354 = vmatmul.mubr.msk.f32.vlgmr.msra.gmra.mrb[2].mxu1 %vm125_vm2, %v109_v41 }
 0x1ae   :  { %v195_v46 = vpop.f32.mrb[2].mxu1 }
 0x1af   :  { %v196_v47 = vadd.f32 %v301_v45, %v195_v46  ;;  %v355_v48 = vpop.f32.mrb[3].mxu1 }
 0x1b1   :  { %v199_v49 = vmax.f32 %v196_v47, 0.0 }
 0x1b3   :  { %389 = vmatmul.mubr.f32.vlgmr.msra.gmra.mrb[0].mxu0 %v199_v49 }
 0x286   :  { %v289_v51 = vpop.f32.mrb[0].mxu0 }
 0x287   :  { %v290_v52 = vadd.f32 %v303_v50, %v289_v51  ;;  %v390_v53 = vpop.f32.mrb[1].mxu0 }
 0x289   :  { %294 = vst.msk [vmem:[%s570_s7] sm:$0xff] %vm293_vm3, %v290_v52 }

</bundles_post_ra>
